<compile_context>
chip_gen: v7x
topology: tpu7x:2x2x1
jax: 0.10.0
libtpu: 0.0.40
codegen_flags: <defaults>
</compile_context>

<pallas_src>
import copy
from collections import defaultdict

import numpy as np
import jax
import jax.numpy as jnp
from jax.experimental import pallas as pl
from jax.experimental.pallas import tpu as pltpu

# ---- synthetic config (small shapes) -------------------------------------------------
BATCH = 8          # number of system turns in the flattened batch
STATE_DIM = 32     # len(slot_set_final) -> width of state_table
ACTION_NUM = 16    # config.action_num
HID = 64           # discriminator hidden width


# ---- Pallas kernel: folded Discriminator forward for one batch tile -------------------
def _reward_kernel(act_ref, state_ref, w_ref, b_ref, out_ref):
    """act_ref  (TB, 1)     int32 : action ids for this batch tile
       state_ref(TB, S)     float : state table tile (cast to bf16 in-kernel)
       w_ref    (S+A+H, H)  bf16  : rows [0:S+A]=[W_sf;W_af] (folded layer 1), [S+A:]=W2
       b_ref    (4, H)      f32   : row0=b_f, row1=b2, row2=w3 row, row3=b3 (broadcast)
       out_ref  (1, TB)     f32   : sigmoid(logits) packed lane-major (lane-dense store)
    """
    TB, S = state_ref.shape
    KW, H = w_ref.shape
    A = KW - S - H
    wdt = w_ref.dtype

    act = act_ref[...]                                        # (TB, 1) int32
    # one_hot_embedding(action_id, A).  Out-of-range ids give an all-zero action
    # contribution (torch one-hot would raise); upstream ids are in [0, A).
    iota = jax.lax.broadcasted_iota(jnp.int32, (TB, A), 1)
    onehot = (iota == act).astype(jnp.float32)                # (TB, A) exact 0/1

    # single merged layer-1 operand: [state | one_hot]  (one MXU push instead of two)
    state_f = state_ref[...].astype(jnp.float32)              # (TB, S)
    xin = jnp.concatenate([state_f, onehot], axis=1).astype(wdt)   # (TB, S+A) bf16

    w1f = w_ref[0:S + A, :]                                   # static ref slices (free)
    w2 = w_ref[S + A:KW, :]
    b_f = b_ref[0:1, :]
    b2 = b_ref[1:2, :]
    w3_row = b_ref[2:3, :]
    b3 = b_ref[3:4, 0:1]

    # folded first layer: x = [state|onehot] @ [ws@w1s ; wa@w1a] + (bs@w1s + ba@w1a + b1)
    x = jnp.dot(xin, w1f, preferred_element_type=jnp.float32) + b_f
    h1 = jnp.maximum(x, 0.2 * x)                              # LeakyReLU(0.2) f32; Dropout=id

    y = jnp.dot(h1.astype(wdt), w2, preferred_element_type=jnp.float32) + b2
    h2 = jnp.maximum(y, 0.2 * y)

    # final Linear(H, 1) computed transposed (contract H) so the result is lane-major (1, TB)
    logits_t = jax.lax.dot_general(
        w3_row, h2, (((1,), (1,)), ((), ())),
        preferred_element_type=jnp.float32)                   # (1, TB) f32
    out_ref[...] = jax.nn.sigmoid(logits_t + b3)              # lane-dense (1, TB) store


# ---- jitted wrapper: RewardAgent.reward_step -------------------------------------------
@jax.jit
def reward_step(action_id, state_table, params):
    """Pallas equivalent of RewardAgent.reward_step (state_type='table', float input).
    Returns (disc_v [B,1] f32, real_state_rep [B,S] f32 — the raw state table, per torch
    read_context for input_type=float)."""
    B, S = state_table.shape
    act = action_id.reshape(B, 1).astype(jnp.int32)

    # batch tiling: single tile for small B; exactly 2 balanced 128-multiple tiles for
    # moderate B (v7x megacore gets 2 grid steps); 512-row tiles for large B.
    if B <= 128:
        b_pad = ((B + 7) // 8) * 8
        tb = b_pad
    elif B <= 1024:
        tb = ((B + 255) // 256) * 128
        b_pad = 2 * tb
    else:
        tb = 512
        b_pad = ((B + tb - 1) // tb) * tb

    if b_pad != B:
        state_p = jnp.pad(state_table, ((0, b_pad - B), (0, 0)))
        act_p = jnp.pad(act, ((0, b_pad - B), (0, 0)))
    else:
        state_p, act_p = state_table, act

    w_slab = params["w_slab"]
    b_slab = params["b_slab"]
    kw, h = w_slab.shape

    out = pl.pallas_call(
        _reward_kernel,
        out_shape=jax.ShapeDtypeStruct((1, b_pad), jnp.float32),
        grid_spec=pltpu.PrefetchScalarGridSpec(
            num_scalar_prefetch=0,
            grid=(b_pad // tb,),
            in_specs=[
                pl.BlockSpec((tb, 1), lambda i: (i, 0)),      # action ids (batch tile)
                pl.BlockSpec((tb, S), lambda i: (i, 0)),      # state table (batch tile)
                pl.BlockSpec((kw, h), lambda i: (0, 0)),      # packed weights (resident)
                pl.BlockSpec((4, h), lambda i: (0, 0)),       # packed biases / w3 row
            ],
            out_specs=pl.BlockSpec((1, tb), lambda i: (0, i)),  # lane-major packed sigmoids
        ),
        compiler_params=pltpu.CompilerParams(
            dimension_semantics=("parallel",)),               # v7x megacore: split batch tiles
    )(act_p, state_p, w_slab, b_slab)

    disc = out[0, :B].reshape(B, 1)                           # contiguous slice, no stride
    # torch read_context ('table' / float): real_state_rep IS the raw state table.
    state_rep = state_table if state_table.dtype == jnp.float32 else state_table.astype(jnp.float32)
    return disc, state_rep


# ---- parameter init (PyTorch nn.Linear-style uniform) + offline fold / packing ---------
def init_params(key):
    S, A, H = STATE_DIM, ACTION_NUM, HID
    Sh, Ah = S // 2, A // 2

    def lin(k, fan_in, fan_out):
        k1, k2 = jax.random.split(k)
        bound = 1.0 / np.sqrt(fan_in)
        w = jax.random.uniform(k1, (fan_in, fan_out), jnp.float32, -bound, bound)
        b = jax.random.uniform(k2, (1, fan_out), jnp.float32, -bound, bound)
        return w, b

    keys = jax.random.split(key, 5)
    ws, bs = lin(keys[0], S, Sh)
    wa, ba = lin(keys[1], A, Ah)
    w1, b1 = lin(keys[2], Sh + Ah, H)
    w2, b2 = lin(keys[3], H, H)
    w3, b3 = lin(keys[4], H, 1)

    # fold the two pre-activation linears into layer 1 (no nonlinearity between them)
    w1s, w1a = w1[:Sh], w1[Sh:]
    w_sf = ws @ w1s                                   # (S, H)
    w_af = wa @ w1a                                   # (A, H)
    b_f = bs @ w1s + ba @ w1a + b1                    # (1, H)

    packed = {
        "w_slab": jnp.concatenate([w_sf, w_af, w2], axis=0).astype(jnp.bfloat16),  # (S+A+H, H)
        "b_slab": jnp.concatenate(
            [b_f, b2, w3.T, jnp.full((1, H), b3[0, 0], jnp.float32)], axis=0
        ).astype(jnp.float32),                                                      # (4, H)
    }
    raw = dict(ws=ws, bs=bs, wa=wa, ba=ba, w1=w1, b1=b1, w2=w2, b2=b2, w3=w3, b3=b3,
               fold=dict(w_sf=w_sf, w_af=w_af, b_f=b_f))
    return packed, raw


# ---- pure-JAX f32 references (unfused + folded) for tolerance checking -------------------
def reference_logits(action_id, state_table, raw):
    onehot = jax.nn.one_hot(action_id, ACTION_NUM, dtype=jnp.float32)
    hs = state_table @ raw["ws"] + raw["bs"]
    ha = onehot @ raw["wa"] + raw["ba"]
    x = jnp.concatenate([hs, ha], axis=1) @ raw["w1"] + raw["b1"]
    h1 = jnp.where(x > 0, x, 0.2 * x)
    y = h1 @ raw["w2"] + raw["b2"]
    h2 = jnp.where(y > 0, y, 0.2 * y)
    return h2 @ raw["w3"] + raw["b3"]


def folded_logits_f32(action_id, state_table, raw):
    """Fold algebra check in f32 (no bf16): must match reference_logits tightly."""
    f = raw["fold"]
    onehot = jax.nn.one_hot(action_id, ACTION_NUM, dtype=jnp.float32)
    x = state_table @ f["w_sf"] + onehot @ f["w_af"] + f["b_f"]
    h1 = jnp.maximum(x, 0.2 * x)
    y = h1 @ raw["w2"] + raw["b2"]
    h2 = jnp.maximum(y, 0.2 * y)
    return h2 @ raw["w3"] + raw["b3"]


def reference_discriminator(action_id, state_table, raw):
    return jax.nn.sigmoid(reference_logits(action_id, state_table, raw))


# ---- host-side glue: pairing_reward (string-keyed dicts, no tensor math) -----------------
def pairing_reward(reward, reward_index, state_rep, action_index, reward_ori_index):
    reward_pair = defaultdict(int)
    state_rep_pair = defaultdict(int)
    action_pair = defaultdict(int)
    reward_ori_pair = defaultdict(float)
    for ind, reward_id in enumerate(reward_index):
        reward_pair[reward_id] = reward[ind]
        if ind < len(reward_index) - 1:
            index_diff = (int(reward_id.strip().split('-')[-1])
                          - int(reward_index[ind + 1].strip().split('-')[-1]))
        else:
            index_diff = 0
        state_rep_pair[reward_id] = ((state_rep[ind], state_rep[ind + 1])
                                     if index_diff == -2
                                     else (state_rep[ind], state_rep[ind]))
        action_pair[reward_id] = action_index[ind]
        reward_ori_pair[reward_id] = reward_ori_index[ind]
    return reward_pair, state_rep_pair, action_pair, reward_ori_pair


def reward_agent_forward(batch_feed, params):
    """RewardAgent.forward tensor path.  The DialogExchanger preprocessing that builds
    batch_feed from raw dialog strings is host-side Python (untranslatable)."""
    reward_index = copy.deepcopy(batch_feed["index_rec"])
    action_index = copy.deepcopy(batch_feed["action_id_list"])
    reward_ori_index = copy.deepcopy(batch_feed["reward_ori"])
    disc_v, state_rep = reward_step(batch_feed["action_id"], batch_feed["state_table"], params)
    # Single device->host transfer (analogue of .cpu().tolist()); reward_step is jitted and
    # not retraced per call, so the hot path has no per-call sync beyond this pairing glue.
    reward_list = np.asarray(disc_v).reshape(-1).tolist()
    state_rep_np = np.asarray(state_rep)
    return pairing_reward(reward_list, reward_index, state_rep_np, action_index, reward_ori_index)


if __name__ == "__main__":
    key = jax.random.PRNGKey(0)
    k_state, k_act, k_param, k_state2, k_act2 = jax.random.split(key, 5)

    # synthetic batch_feed (what DialogExchanger.prepare_batch would have produced)
    state_table = jax.random.uniform(k_state, (BATCH, STATE_DIM), jnp.float32)
    action_id = jax.random.randint(k_act, (BATCH,), 0, ACTION_NUM, dtype=jnp.int32)
    packed, raw = init_params(k_param)

    # (a) fold algebra check in pure f32, tight tolerance (pre-sigmoid logits)
    np.testing.assert_allclose(
        np.asarray(folded_logits_f32(action_id, state_table, raw)),
        np.asarray(reference_logits(action_id, state_table, raw)),
        rtol=1e-4, atol=1e-4)

    # (b) run the kernel once (small batch, single tile) and block on the result
    disc, state_rep = reward_step(action_id, state_table, packed)
    disc = jax.block_until_ready(disc)
    assert disc.shape == (BATCH, 1)
    assert state_rep.shape == (BATCH, STATE_DIM)

    ref = reference_discriminator(action_id, state_table, raw)
    np.testing.assert_allclose(np.asarray(disc), np.asarray(ref), atol=2e-2)

    # (c) multi-tile path (grid of 2 batch tiles — the megacore-splittable shape)
    B2 = 200
    state2 = jax.random.uniform(k_state2, (B2, STATE_DIM), jnp.float32)
    act2 = jax.random.randint(k_act2, (B2,), 0, ACTION_NUM, dtype=jnp.int32)
    disc2, _ = reward_step(act2, state2, packed)
    disc2 = jax.block_until_ready(disc2)
    assert disc2.shape == (B2, 1)
    ref2 = reference_discriminator(act2, state2, raw)
    np.testing.assert_allclose(np.asarray(disc2), np.asarray(ref2), atol=2e-2)

    # (d) full forward with host pairing glue (mirrors RewardAgent.forward after DialogExchanger)
    index_rec = [f"0-{2 * i + 1}" for i in range(BATCH)]
    reward_ori = [-0.1] * (BATCH - 1) + [0.2 * 40]
    batch_feed = {
        "state_table": state_table,
        "action_id": action_id,
        "action_id_list": [int(a) for a in np.asarray(action_id)],
        "index_rec": index_rec,
        "reward_ori": reward_ori,
    }
    reward_final, state_rep_pair, action_pair, reward_ori_pair = reward_agent_forward(batch_feed, packed)

    assert len(reward_final) == BATCH
    assert all(0.0 <= v <= 1.0 for v in reward_final.values())
    print("KERNEL_OK")
</pallas_src>

<mosaic_0001>
module attributes {stable_mosaic.version = 11 : i64} {
  func.func @_reward_kernel(%arg0: i32, %arg1: memref<8x1xi32, #tpu.memory_space<vmem>>, %arg2: memref<8x32xf32, #tpu.memory_space<vmem>>, %arg3: memref<112x64xbf16, #tpu.memory_space<vmem>>, %arg4: memref<4x64xf32, #tpu.memory_space<vmem>>, %arg5: memref<1x8xf32, #tpu.memory_space<vmem>>) attributes {dimension_semantics = [#tpu.dimension_semantics<parallel>], iteration_bounds = array<i64: 1>, scalar_prefetch = 0 : i64, scratch_operands = 0 : i64, tpu.core_type = #tpu.core_type<tc>, window_params = [{transform_indices = @transform_0, window_bounds = array<i64: 8, 1>}, {transform_indices = @transform_1, window_bounds = array<i64: 8, 32>}, {pipeline_mode = #tpu.pipeline_mode<synchronous>, transform_indices = @transform_2, window_bounds = array<i64: 112, 64>}, {pipeline_mode = #tpu.pipeline_mode<synchronous>, transform_indices = @transform_3, window_bounds = array<i64: 4, 64>}, {transform_indices = @transform_4, window_bounds = array<i64: 1, 8>}]} {
    %c0 = arith.constant 0 : index
    %c0_0 = arith.constant 0 : index
    %0 = vector.load %arg1[%c0, %c0_0] : memref<8x1xi32, #tpu.memory_space<vmem>>, vector<8x1xi32>
    %1 = tpu.iota {dimensions = array<i32: 1>} : vector<8x16xi32>
    %2 = vector.broadcast %0 : vector<8x1xi32> to vector<8x16xi32>
    %3 = arith.cmpi eq, %1, %2 : vector<8x16xi32>
    %4 = arith.extui %3 : vector<8x16xi1> to vector<8x16xi32>
    %5 = arith.sitofp %4 : vector<8x16xi32> to vector<8x16xf32>
    %c0_1 = arith.constant 0 : index
    %c0_2 = arith.constant 0 : index
    %6 = vector.load %arg2[%c0_1, %c0_2] : memref<8x32xf32, #tpu.memory_space<vmem>>, vector<8x32xf32>
    %7 = tpu.concatenate %6, %5 in 1 : vector<8x32xf32>, vector<8x16xf32> -> vector<8x48xf32>
    %8 = arith.truncf %7 : vector<8x48xf32> to vector<8x48xbf16>
    %c0_3 = arith.constant 0 : index
    %c0_4 = arith.constant 0 : index
    %9 = vector.load %arg3[%c0_3, %c0_4] : memref<112x64xbf16, #tpu.memory_space<vmem>>, vector<48x64xbf16>
    %c48 = arith.constant 48 : index
    %c0_5 = arith.constant 0 : index
    %10 = vector.load %arg3[%c48, %c0_5] : memref<112x64xbf16, #tpu.memory_space<vmem>>, vector<64x64xbf16>
    %c0_6 = arith.constant 0 : index
    %c0_7 = arith.constant 0 : index
    %11 = vector.load %arg4[%c0_6, %c0_7] : memref<4x64xf32, #tpu.memory_space<vmem>>, vector<1x64xf32>
    %c1 = arith.constant 1 : index
    %c0_8 = arith.constant 0 : index
    %12 = vector.load %arg4[%c1, %c0_8] : memref<4x64xf32, #tpu.memory_space<vmem>>, vector<1x64xf32>
    %c2 = arith.constant 2 : index
    %c0_9 = arith.constant 0 : index
    %13 = vector.load %arg4[%c2, %c0_9] : memref<4x64xf32, #tpu.memory_space<vmem>>, vector<1x64xf32>
    %c3 = arith.constant 3 : index
    %c0_10 = arith.constant 0 : index
    %14 = vector.load %arg4[%c3, %c0_10] : memref<4x64xf32, #tpu.memory_space<vmem>>, vector<1x1xf32>
    %cst = arith.constant dense<0.000000e+00> : vector<8x64xf32>
    %15 = tpu.matmul %8, %9, %cst {dimension_numbers = #tpu.dot_dimension_numbers<[1], [0], [0], [1], [0, 0, 1, 1], [], []>} : vector<8x48xbf16>, vector<48x64xbf16>, vector<8x64xf32> -> vector<8x64xf32>
    %16 = vector.broadcast %11 : vector<1x64xf32> to vector<8x64xf32>
    %17 = arith.addf %15, %16 : vector<8x64xf32>
    %cst_11 = arith.constant 2.000000e-01 : f32
    %18 = vector.broadcast %cst_11 : f32 to vector<8x64xf32>
    %19 = arith.mulf %18, %17 : vector<8x64xf32>
    %20 = arith.maximumf %17, %19 : vector<8x64xf32>
    %21 = arith.truncf %20 : vector<8x64xf32> to vector<8x64xbf16>
    %cst_12 = arith.constant dense<0.000000e+00> : vector<8x64xf32>
    %22 = tpu.matmul %21, %10, %cst_12 {dimension_numbers = #tpu.dot_dimension_numbers<[1], [0], [0], [1], [0, 0, 1, 1], [], []>} : vector<8x64xbf16>, vector<64x64xbf16>, vector<8x64xf32> -> vector<8x64xf32>
    %23 = vector.broadcast %12 : vector<1x64xf32> to vector<8x64xf32>
    %24 = arith.addf %22, %23 : vector<8x64xf32>
    %cst_13 = arith.constant 2.000000e-01 : f32
    %25 = vector.broadcast %cst_13 : f32 to vector<8x64xf32>
    %26 = arith.mulf %25, %24 : vector<8x64xf32>
    %27 = arith.maximumf %24, %26 : vector<8x64xf32>
    %cst_14 = arith.constant dense<0.000000e+00> : vector<1x8xf32>
    %28 = tpu.matmul %13, %27, %cst_14 {dimension_numbers = #tpu.dot_dimension_numbers<[1], [1], [0], [0], [0, 0, 1, 0], [], []>} : vector<1x64xf32>, vector<8x64xf32>, vector<1x8xf32> -> vector<1x8xf32>
    %29 = vector.broadcast %14 : vector<1x1xf32> to vector<1x8xf32>
    %30 = arith.addf %28, %29 : vector<1x8xf32>
    %31 = arith.negf %30 : vector<1x8xf32>
    %32 = math.exp %31 : vector<1x8xf32>
    %cst_15 = arith.constant 1.000000e+00 : f32
    %33 = vector.broadcast %cst_15 : f32 to vector<1x8xf32>
    %34 = arith.addf %33, %32 : vector<1x8xf32>
    %35 = arith.divf %33, %34 : vector<1x8xf32>
    %c0_16 = arith.constant 0 : index
    %c0_17 = arith.constant 0 : index
    %36 = vector.load %arg5[%c0_16, %c0_17] : memref<1x8xf32, #tpu.memory_space<vmem>>, vector<1x8xf32>
    tpu.vector_store %arg5[%c0_16, %c0_17], %35 {strides = array<i32>} : memref<1x8xf32, #tpu.memory_space<vmem>>, vector<1x8xf32>,
    return
  }
  func.func @transform_0(%arg0: i32) -> (i32, i32) {
    %c0_i32 = arith.constant 0 : i32
    %c0_i32_0 = arith.constant 0 : i32
    return %arg0, %c0_i32 : i32, i32
  }
  func.func @transform_1(%arg0: i32) -> (i32, i32) {
    %c0_i32 = arith.constant 0 : i32
    %c0_i32_0 = arith.constant 0 : i32
    return %arg0, %c0_i32 : i32, i32
  }
  func.func @transform_2(%arg0: i32) -> (i32, i32) {
    %c0_i32 = arith.constant 0 : i32
    %c0_i32_0 = arith.constant 0 : i32
    %c0_i32_1 = arith.constant 0 : i32
    return %c0_i32, %c0_i32_0 : i32, i32
  }
  func.func @transform_3(%arg0: i32) -> (i32, i32) {
    %c0_i32 = arith.constant 0 : i32
    %c0_i32_0 = arith.constant 0 : i32
    %c0_i32_1 = arith.constant 0 : i32
    return %c0_i32, %c0_i32_0 : i32, i32
  }
  func.func @transform_4(%arg0: i32) -> (i32, i32) {
    %c0_i32 = arith.constant 0 : i32
    %c0_i32_0 = arith.constant 0 : i32
    return %c0_i32, %arg0 : i32, i32
  }
}

</mosaic_0001>

<bundles_post_ra>
// kernel: reward_step.1
= control target key start
LH: loop header
LB: loop body
LE: loop exit
PB: predicated region body
PF: predicated region fallthrough
CT: control target
= control target key end

     0   :  { %v395_v1 = vmov 0   ;;  %v396_v2 = vmov 0.0   ;;  %s479_s0 = inlined_call_operand.vmem [shape: s32[8,1], index: 0, kind: input, shape index: {}]   ;;  %s480_s1 = inlined_call_operand.vmem [shape: f32[8,32], index: 1, kind: input, shape index: {}]   ;;  %s481_s2 = inlined_call_operand.vmem [shape: bf16[112,64], index: 2, kind: input, shape index: {}]   ;;  %s482_s3 = inlined_call_operand.vmem [shape: f32[4,64], index: 3, kind: input, shape index: {}]   ;;  %s483_s4 = inlined_call_operand.hbm [shape: f32[1,8], index: 4, kind: output, shape index: {}]  }
   0x1   :  { %v19_v0 = vld [vmem:[%s479_s0] sm:$0xff]  ;;  %358 = vset.pattern.permute.xlu0 %v395_v1  ;;  %326 = vmatprep.subr.bf16.mxu0 %v396_v2  ;;  %v361_v4 = vld [vmem:[%s481_s2 + $0x8] sm:$0xff]  }
   0x2   :  { %23 = vperm.xlu0 %358, %v19_v0   ;;  %336 = vmatprep.subr.bf16.mxu1 %v396_v2  ;;  %v360_v3 = vld [vmem:[%s481_s2] sm:$0xff]  }
   0x3   :  { %359 = vset.pattern.permute.xlu1 %v395_v1  ;;  %327 = vmatpush3.bf16.msra.mxu0 %v360_v3 }
   0x4   :  { %328 = vmatprep.subr.bf16.mxu0 %v396_v2 }
   0x5   :  { %9 = vsyncpa [#allocation3], 0  ;;  %v362_v5 = vld [vmem:[%s481_s2 + $0x10] sm:$0xff]   ;;  %vm397_vm0 = vmmov 0   ;;  %v20_v6 = vlaneseq  ;;  %v363_v7 = vld [vmem:[%s481_s2 + $0x18] sm:$0xff]   ;;  %s398_s26 = smov 32  }
   0x6   :  { %332 = vmatprep.mubr.msk.bf16.mxu0 %vm397_vm0, %v396_v2  ;;  %344 = vmatprep.mubr.msk.bf16.mxu1 %vm397_vm0, %v396_v2  ;;  %v364_v8 = vld [vmem:[%s481_s2 + $0x20] sm:$0xff]   ;;  %vm33_vm2 = vcmask 261120   ;;  %vm76_vm3 = vcmask 392192   ;;  %v365_v16 = vld [vmem:[%s481_s2 + $0x28] sm:$0xff]   ;;  %v366_v17 = vld [vmem:[%s481_s2 + $0x30] sm:$0xff]   ;;  %vm151_vm4 = vcmask 523264  }
   0x7   :  { %329 = vmatpush3.bf16.msra.mxu0 %v361_v4  ;;  %337 = vmatpush3.bf16.msra.mxu1 %v363_v7  ;;  %v21_v9 = vand.u32 127, %v20_v6  ;;  %v28_v12 = vld [vmem:[%s480_s1] sm:$0xff]  ;;  %s399_s13 = smov [#allocation2]   ;;  %vm284_vm5 = vcmask 57344  }
   0x8   :  { %330 = vmatprep.subr.bf16.mxu0 %v396_v2  ;;  %338 = vmatprep.subr.bf16.mxu1 %v396_v2  ;;  %v301_v18 = vld [vmem:[%s482_s3] ss:$0 sm:$0xff]  ;;  %v53_v27 = vld [vmem:[%s482_s3 + $0x3] sm:$0x1]  ;;  %v306_v28 = vld [vmem:[%s482_s3 + $0x1] ss:$0 sm:$0xff] }
   0x9   :  { %199 = vperm.xlu1 %359, %v53_v27   ;;  %v52_v36 = vld [vmem:[%s482_s3 + $0x2] sm:$0x1]  ;;  %s292_s14 = sshll.u32 %s399_s13, 4  ;;  %s293_s14 = int_to_ptr.vmem [resolvable:$true] %s292_s14 }
   0xa   :  { %s371_s15 = scalar_lea.vmem %s293_s14, 16  ;;  %s375_s16 = scalar_lea.vmem %s293_s14, 32 }
   0xb   :  { %331 = vmatpush3.bf16.msra.mxu0 %v362_v5  ;;  %339 = vmatpush3.bf16.msra.mxu1 %v364_v8  ;;  %p372_p0 = scmp.ne.s32.totalorder %s293_s14, %s371_s15  ;;  %p376_p1 = scmp.lt.s32.totalorder %s293_s14, %s293_s14 }
   0xc   :  { %348 = vmatprep.subr.mxu0 %v396_v2  ;;  %340 = vmatprep.subr.bf16.mxu1 %v396_v2  ;;  %p377_p2 = scmp.lt.s32.totalorder %s375_s16, %s371_s15 }
   0xe   :  { %p378_p3 = por %p377_p2, %p376_p1 }
   0xf   :  { %341 = vmatpush3.bf16.msra.mxu1 %v365_v16 }
  0x10   :  { %342 = vmatprep.subr.bf16.mxu1 %v396_v2  ;;  %p379_p4 = pnand %p378_p3, %p372_p0 }
  0x13   :  { %343 = vmatpush3.bf16.msra.mxu1 %v366_v17 }
  0x81   :  { %v24_v10 = vpop.permute.xlu0 %23 }
  0x82   :  { %vm25_vm1 = vcmp.eq.s32.totalorder %v21_v9, %v24_v10 }
  0x83   :  { %v300_v11 = vsel %vm25_vm1, 1.0, %v396_v2 }
  0x84   :  { %30 = vrot.lane.b32.xlu0 %v300_v11, %s398_s26 }
  0x88   :  { %v200_v37 = vpop.permute.xlu1 %199 }
  0xf6   :  { %v31_v13 = vpop.permute.xlu0 %30 }
  0xf7   :  { %v34_v14 = vsel %vm33_vm2, %v28_v12, %v31_v13 }
  0xf8   :  { %v35_v15 = vpack.c.bf16 %v34_v14, %v34_v14 }
  0xfa   :  { %333 = vmatmul.mubr.msk.bf16.vlgmr.msra.gmra.mrb[0].mxu0 %vm76_vm3, %v35_v15 }
  0xfb   :  { %350 = vmatprep.mubr.msk.f32.mxu0 %vm397_vm0, %v396_v2 }
 0x1cd   :  { %v114_v19 = vpop.f32.mrb[0].mxu0 }
 0x1ce   :  { %v115_v20 = vadd.f32 %v301_v18, %v114_v19  ;;  %v334_v21 = vpop.f32.mrb[1].mxu0 }
 0x1cf   :  { %v117_v22 = vpop.f32.mrb[2].mxu0 }
 0x1d0   :  { %v120_v23 = vmul.f32 0.2, %v115_v20  ;;  %v335_v24 = vpop.f32.mrb[3].mxu0 }
 0x1d2   :  { %v121_v25 = vmax.f32 %v115_v20, %v120_v23 }
 0x1d4   :  { %v122_v26 = vpack.c.bf16 %v121_v25, %v121_v25 }
 0x1d6   :  { %345 = vmatmul.mubr.msk.bf16.vlgmr.msra.gmra.mrb[0].mxu1 %vm151_vm4, %v122_v26 }
 0x2a9   :  { %v189_v29 = vpop.f32.mrb[0].mxu1 }
 0x2aa   :  { %v190_v30 = vadd.f32 %v306_v28, %v189_v29  ;;  %v346_v31 = vpop.f32.mrb[1].mxu1 }
 0x2ab   :  { %v192_v32 = vpop.f32.mrb[2].mxu1 }
 0x2ac   :  { %v195_v33 = vmul.f32 0.2, %v190_v30  ;;  %v347_v34 = vpop.f32.mrb[3].mxu1 }
 0x2ae   :  { %v196_v35 = vmax.f32 %v190_v30, %v195_v33 }
 0x2b0   :  { %349 = vmatpush3.xpose.msk.msra.mxu0 %vm151_vm4, %v196_v35 }
 0x2b3   :  { %351 = vmatmul.mubr.msk.f32.vlgmr.msra.gmra.mrb[4].mxu0 %vm151_vm4, %v52_v36 }
 0x386   :  { %v274_v38 = vpop.f32.mrb[4].mxu0 }
 0x387   :  { %v275_v39 = vadd.f32 %v274_v38, %v200_v37  ;;  %v352_v40 = vpop.f32.mrb[5].mxu0 }
 0x389   :  { %v314_v41 = vmul.f32 -1.442695, %v275_v39 }
 0x38b   :  { %367 = vpow2.f32 %v314_v41 }
 0x395   :  { %v368_v42 = vpop.eup %367 }
 0x396   :  { %v281_v43 = vadd.f32 1.0, %v368_v42 }
 0x398   :  { %369 = vrcp.f32 %v281_v43 }
 0x3a2   :  { %v370_v44 = vpop.eup %369 }
 0x3a3   :  { %285 = vst.msk [vmem:[#allocation2] sm:$0x1] %vm284_vm5, %v370_v44 }
 0x3a4   :  { %382 = shalt.err (!%p379_p4)
}
 0x3a5   :  { %s383_s18 = scalar_lea.hbm %s483_s4, 16 }
 0x3a6   :  { %p384_p5 = scmp.ne.s32.totalorder %s483_s4, %s383_s18  ;;  %p387_p6 = scmp.lt.u32.totalorder %s383_s18, %s483_s4 }
 0x3a8   :  { %p389_p7 = pnand %p387_p6, %p384_p5 }
 0x3aa   :  { %392 = shalt.err (!%p389_p7)
}
 0x3ab   :  { %295 = dma.vmem_to_hbm [thread:$0]  %s293_s14, 16, %s483_s4, [#allocation3]  }
 0x3ac   :  { %393 = dma.done.wait [#allocation3], 16  }
 0x3ad   :  { %394 = vsyncadd [#allocation3], 4294967280 }
 0x3ae   :  { %299 = vsyncpa [#allocation3], 1 }

</bundles_post_ra>
